<compile_context>
chip_gen: v7x
topology: tpu7x:2x2x1
jax: 0.10.0
libtpu: 0.0.40
codegen_flags: <defaults>
</compile_context>

<pallas_src>
import jax
import jax.numpy as jnp
import numpy as np
from jax import lax
from jax.experimental import pallas as pl
from jax.experimental.pallas import tpu as pltpu

_LANE = 128
# Per-channel elements per input block (~512 KiB f32/channel -> ~1.5 MiB per
# 3-channel block, ~3 MiB double-buffered).
_BLOCK_ELEMS = 128 * 1024


def _round_up(x: int, m: int) -> int:
    return ((x + m - 1) // m) * m


def _round_down(x: int, m: int) -> int:
    return (x // m) * m


def _make_sa_loss_kernel(*, acc_rows, n_groups, tiles_total, tiles_per_split,
                         valid_rows_last, has_partial, needs_guard):
    def kernel(means_ref, x_ref, o_ref):
        i = pl.program_id(0)            # batch          ("parallel")
        s = pl.program_id(1)            # spatial split  ("parallel", v7x megacore)
        j = pl.program_id(2)            # spatial tile   ("arbitrary", reduction)
        t = s * tiles_per_split + j     # global spatial tile index

        # Output block is resident across j -> acts as the accumulator.
        @pl.when(j == 0)
        def _init():
            o_ref[...] = jnp.zeros_like(o_ref)

        def _accumulate(apply_tail_mask):
            # (tile_h, W) slab per channel; astype is a no-op for f32 and a
            # per-tile upcast for bf16.
            xr = x_ref[0, 0].astype(jnp.float32)
            xg = x_ref[0, 1].astype(jnp.float32)
            xb = x_ref[0, 2].astype(jnp.float32)
            dr = xr - means_ref[i, 0]
            dg = xg - means_ref[i, 1]
            db = xb - means_ref[i, 2]
            k = jnp.sqrt(dr * dr + dg * dg + db * db)        # (tile_h, W)
            if apply_tail_mask:
                # Only the last (partial) tile: drop garbage rows past H.
                rows = lax.broadcasted_iota(jnp.int32, k.shape, 0)
                k = jnp.where(rows < valid_rows_last, k, 0.0)
            # Group-reduce the rows down to an (acc_rows, W) partial with
            # aligned sublane-tile slabs (pure VALU adds, no XLU, 1 RMW).
            part = k[0:acc_rows, :]
            for g in range(1, n_groups):
                part = part + k[g * acc_rows:(g + 1) * acc_rows, :]
            o_ref[0, 0] += part

        if has_partial:
            # Unmasked fast path for interior tiles; mask only on the last.
            pl.when(t < tiles_total - 1)(lambda: _accumulate(False))
            pl.when(t == tiles_total - 1)(lambda: _accumulate(True))
        elif needs_guard:
            # Skip the duplicated (clamped) tile of the second split half.
            pl.when(t < tiles_total)(lambda: _accumulate(False))
        else:
            _accumulate(False)

    return kernel


def sa_loss(x: jax.Array, *, block_elems: int = _BLOCK_ELEMS) -> jax.Array:
    """x: (B, 3, H, W) NCHW (f32 or bf16). Returns scalar f32 loss."""
    b, c, h, w = x.shape
    assert c == 3, "Sa_Loss expects 3 channels (r, g, b)"

    itemsize = jnp.dtype(x.dtype).itemsize
    sub = {4: 8, 2: 16, 1: 32}.get(itemsize, 8)     # sublane granularity

    # Tile along H only; W is always the full (lane) dim so no padding/copies
    # are ever materialized in HBM.
    w_pad = _round_up(w, _LANE)                     # physical lane width (VMEM budget)
    rows_budget = max(sub, _round_down(block_elems // w_pad, sub))
    tile_h = h if h <= rows_budget else rows_budget # full dim OR multiple of `sub`
    tiles_total = pl.cdiv(h, tile_h)

    # v7x megacore: if the batch alone can't occupy both TensorCores evenly,
    # split the spatial reduction into two "parallel" halves.
    n_split = 2 if (b % 2 == 1 and tiles_total >= 2) else 1
    tiles_per_split = pl.cdiv(tiles_total, n_split)
    needs_guard = (n_split * tiles_per_split != tiles_total)

    has_partial = (tiles_total * tile_h != h)
    valid_rows_last = h - (tiles_total - 1) * tile_h

    acc_rows = 8 if tile_h % 8 == 0 else tile_h     # (8, W) partial accumulator
    n_groups = tile_h // acc_rows

    # Per-batch, per-channel means: one fused f32-accumulating pass over x
    # (no materialized f32 copy); handed to the kernel through SMEM.
    means = jnp.mean(x, axis=(2, 3), dtype=jnp.float32)      # (B, 3)

    if needs_guard:
        def x_index(i, s, j):
            return (i, 0, jnp.minimum(s * tiles_per_split + j, tiles_total - 1), 0)
    else:
        def x_index(i, s, j):
            return (i, 0, s * tiles_per_split + j, 0)

    kernel = _make_sa_loss_kernel(
        acc_rows=acc_rows, n_groups=n_groups, tiles_total=tiles_total,
        tiles_per_split=tiles_per_split, valid_rows_last=valid_rows_last,
        has_partial=has_partial, needs_guard=needs_guard)

    out = pl.pallas_call(
        kernel,
        out_shape=jax.ShapeDtypeStruct((b, n_split, acc_rows, w), jnp.float32),
        grid_spec=pltpu.PrefetchScalarGridSpec(
            num_scalar_prefetch=0,
            grid=(b, n_split, tiles_per_split),
            in_specs=[
                pl.BlockSpec(memory_space=pltpu.MemorySpace.SMEM),   # means (B,3)
                pl.BlockSpec((1, c, tile_h, w), x_index),
            ],
            out_specs=pl.BlockSpec((1, 1, acc_rows, w),
                                   lambda i, s, j: (i, s, 0, 0)),
        ),
        compiler_params=pltpu.CompilerParams(
            dimension_semantics=("parallel", "parallel", "arbitrary"),
        ),
    )(means, x)

    # Tiny final reduction over (B, n_split, acc_rows, W) partial sums.
    return jnp.sum(out, dtype=jnp.float32) / float(b * h * w)


def sa_loss_ref(x: jax.Array) -> jax.Array:
    """Pure-JAX reference mirroring the PyTorch forward."""
    mean_rgb = jnp.mean(x, axis=(2, 3), keepdims=True)
    d = x - mean_rgb
    k = jnp.sqrt(jnp.sum(d * d, axis=1, keepdims=True))
    return jnp.mean(k)


if __name__ == "__main__":
    key = jax.random.PRNGKey(0)
    k1, k2, k3 = jax.random.split(key, 3)

    # 1) Basic f32 case (single full-height tile per batch).
    x1 = jax.random.uniform(k1, (2, 3, 16, 16), dtype=jnp.float32)
    out1 = jax.block_until_ready(sa_loss(x1))
    ref1 = jax.block_until_ready(sa_loss_ref(x1))
    assert np.allclose(np.asarray(out1), np.asarray(ref1), rtol=1e-5, atol=1e-5), (
        f"mismatch (f32 basic): kernel={out1} ref={ref1}")

    # 2) Multi-tile + partial last tile + odd tile count with B==1:
    #    exercises the last-tile mask, the parallel spatial split, and the
    #    clamped index map (small block budget forces several tiles).
    x2 = jax.random.uniform(k2, (1, 3, 40, 24), dtype=jnp.float32)
    out2 = jax.block_until_ready(sa_loss(x2, block_elems=16 * _LANE))
    ref2 = jax.block_until_ready(sa_loss_ref(x2))
    assert np.allclose(np.asarray(out2), np.asarray(ref2), rtol=1e-5, atol=1e-5), (
        f"mismatch (f32 tiled/masked/split): kernel={out2} ref={ref2}")

    # 3) bf16 input stays bf16 into the kernel (f32 math inside).
    x3 = jax.random.uniform(k3, (2, 3, 48, 64), dtype=jnp.float32).astype(jnp.bfloat16)
    out3 = jax.block_until_ready(sa_loss(x3))
    ref3 = jax.block_until_ready(sa_loss_ref(x3.astype(jnp.float32)))
    assert np.allclose(np.asarray(out3), np.asarray(ref3), rtol=1e-3, atol=1e-3), (
        f"mismatch (bf16): kernel={out3} ref={ref3}")

    print("KERNEL_OK")
</pallas_src>

<mosaic_0001>
module attributes {stable_mosaic.version = 11 : i64} {
  func.func @kernel(%arg0: i32, %arg1: i32, %arg2: i32, %arg3: memref<2x3xf32, #tpu.memory_space<smem>>, %arg4: memref<1x3x16x16xf32, #tpu.memory_space<vmem>>, %arg5: memref<1x1x8x16xf32, #tpu.memory_space<vmem>>) attributes {dimension_semantics = [#tpu.dimension_semantics<parallel>, #tpu.dimension_semantics<parallel>, #tpu.dimension_semantics<arbitrary>], iteration_bounds = array<i64: 2, 1, 1>, scalar_prefetch = 0 : i64, scratch_operands = 0 : i64, tpu.core_type = #tpu.core_type<tc>, window_params = [{transform_indices = @transform_0, window_bounds = array<i64: 2, 3>}, {transform_indices = @transform_1, window_bounds = array<i64: 1, 3, 16, 16>}, {transform_indices = @transform_2, window_bounds = array<i64: 1, 1, 8, 16>}]} {
    %c0_i32 = arith.constant 0 : i32
    %0 = arith.cmpi eq, %arg2, %c0_i32 : i32
    %1 = arith.extui %0 : i1 to i32
    %c0_i32_0 = arith.constant 0 : i32
    %2 = arith.cmpi ne, %1, %c0_i32_0 : i32
    scf.if %2 {
      %cst = arith.constant 0.000000e+00 : f32
      %36 = vector.broadcast %cst : f32 to vector<1x1x8x16xf32>
      %c0_21 = arith.constant 0 : index
      %c0_22 = arith.constant 0 : index
      %c0_23 = arith.constant 0 : index
      %c0_24 = arith.constant 0 : index
      %37 = vector.load %arg5[%c0_21, %c0_22, %c0_23, %c0_24] : memref<1x1x8x16xf32, #tpu.memory_space<vmem>>, vector<1x1x8x16xf32>
      tpu.vector_store %arg5[%c0_21, %c0_22, %c0_23, %c0_24], %36 {strides = array<i32>} : memref<1x1x8x16xf32, #tpu.memory_space<vmem>>, vector<1x1x8x16xf32>,
    } else {
    }
    %c0 = arith.constant 0 : index
    %c0_1 = arith.constant 0 : index
    %c0_2 = arith.constant 0 : index
    %c0_3 = arith.constant 0 : index
    %3 = vector.load %arg4[%c0, %c0_1, %c0_2, %c0_3] : memref<1x3x16x16xf32, #tpu.memory_space<vmem>>, vector<1x1x16x16xf32>
    %4 = vector.shape_cast %3 : vector<1x1x16x16xf32> to vector<16x16xf32>
    %c0_4 = arith.constant 0 : index
    %c1 = arith.constant 1 : index
    %c0_5 = arith.constant 0 : index
    %c0_6 = arith.constant 0 : index
    %5 = vector.load %arg4[%c0_4, %c1, %c0_5, %c0_6] : memref<1x3x16x16xf32, #tpu.memory_space<vmem>>, vector<1x1x16x16xf32>
    %6 = vector.shape_cast %5 : vector<1x1x16x16xf32> to vector<16x16xf32>
    %c0_7 = arith.constant 0 : index
    %c2 = arith.constant 2 : index
    %c0_8 = arith.constant 0 : index
    %c0_9 = arith.constant 0 : index
    %7 = vector.load %arg4[%c0_7, %c2, %c0_8, %c0_9] : memref<1x3x16x16xf32, #tpu.memory_space<vmem>>, vector<1x1x16x16xf32>
    %8 = vector.shape_cast %7 : vector<1x1x16x16xf32> to vector<16x16xf32>
    %9 = arith.index_cast %arg0 : i32 to index
    %c0_10 = arith.constant 0 : index
    %10 = memref.load %arg3[%9, %c0_10] : memref<2x3xf32, #tpu.memory_space<smem>>
    %11 = vector.broadcast %10 : f32 to vector<16x16xf32>
    %12 = arith.subf %4, %11 : vector<16x16xf32>
    %13 = arith.index_cast %arg0 : i32 to index
    %c1_11 = arith.constant 1 : index
    %14 = memref.load %arg3[%13, %c1_11] : memref<2x3xf32, #tpu.memory_space<smem>>
    %15 = vector.broadcast %14 : f32 to vector<16x16xf32>
    %16 = arith.subf %6, %15 : vector<16x16xf32>
    %17 = arith.index_cast %arg0 : i32 to index
    %c2_12 = arith.constant 2 : index
    %18 = memref.load %arg3[%17, %c2_12] : memref<2x3xf32, #tpu.memory_space<smem>>
    %19 = vector.broadcast %18 : f32 to vector<16x16xf32>
    %20 = arith.subf %8, %19 : vector<16x16xf32>
    %21 = arith.mulf %12, %12 : vector<16x16xf32>
    %22 = arith.mulf %16, %16 : vector<16x16xf32>
    %23 = arith.addf %21, %22 : vector<16x16xf32>
    %24 = arith.mulf %20, %20 : vector<16x16xf32>
    %25 = arith.addf %23, %24 : vector<16x16xf32>
    %26 = math.sqrt %25 : vector<16x16xf32>
    %27 = vector.extract_strided_slice %26 {offsets = [0, 0], sizes = [8, 16], strides = [1, 1]} : vector<16x16xf32> to vector<8x16xf32>
    %28 = vector.extract_strided_slice %26 {offsets = [8, 0], sizes = [8, 16], strides = [1, 1]} : vector<16x16xf32> to vector<8x16xf32>
    %29 = arith.addf %27, %28 : vector<8x16xf32>
    %c0_13 = arith.constant 0 : index
    %c0_14 = arith.constant 0 : index
    %c0_15 = arith.constant 0 : index
    %c0_16 = arith.constant 0 : index
    %30 = vector.load %arg5[%c0_13, %c0_14, %c0_15, %c0_16] : memref<1x1x8x16xf32, #tpu.memory_space<vmem>>, vector<1x1x8x16xf32>
    %31 = vector.shape_cast %30 : vector<1x1x8x16xf32> to vector<8x16xf32>
    %32 = arith.addf %31, %29 : vector<8x16xf32>
    %c0_17 = arith.constant 0 : index
    %c0_18 = arith.constant 0 : index
    %c0_19 = arith.constant 0 : index
    %c0_20 = arith.constant 0 : index
    %33 = vector.load %arg5[%c0_17, %c0_18, %c0_19, %c0_20] : memref<1x1x8x16xf32, #tpu.memory_space<vmem>>, vector<1x1x8x16xf32>
    %34 = vector.shape_cast %33 : vector<1x1x8x16xf32> to vector<8x16xf32>
    %35 = vector.shape_cast %32 : vector<8x16xf32> to vector<1x1x8x16xf32>
    tpu.vector_store %arg5[%c0_17, %c0_18, %c0_19, %c0_20], %35 {strides = array<i32>} : memref<1x1x8x16xf32, #tpu.memory_space<vmem>>, vector<1x1x8x16xf32>,
    return
  }
  func.func @transform_0(%arg0: i32, %arg1: i32, %arg2: i32) -> (i32, i32) {
    %c0_i32 = arith.constant 0 : i32
    %c0_i32_0 = arith.constant 0 : i32
    %c0_i32_1 = arith.constant 0 : i32
    return %c0_i32, %c0_i32_0 : i32, i32
  }
  func.func @transform_1(%arg0: i32, %arg1: i32, %arg2: i32) -> (i32, i32, i32, i32) {
    %c1_i32 = arith.constant 1 : i32
    %0 = arith.muli %arg1, %c1_i32 : i32
    %1 = arith.addi %0, %arg2 : i32
    %c0_i32 = arith.constant 0 : i32
    %c0_i32_0 = arith.constant 0 : i32
    %c0_i32_1 = arith.constant 0 : i32
    return %arg0, %c0_i32, %1, %c0_i32_0 : i32, i32, i32, i32
  }
  func.func @transform_2(%arg0: i32, %arg1: i32, %arg2: i32) -> (i32, i32, i32, i32) {
    %c0_i32 = arith.constant 0 : i32
    %c0_i32_0 = arith.constant 0 : i32
    %c0_i32_1 = arith.constant 0 : i32
    return %arg0, %arg1, %c0_i32, %c0_i32_0 : i32, i32, i32, i32
  }
}

</mosaic_0001>

<bundles_post_ra>
// kernel: tpu_custom_call.1
= control target key start
LH: loop header
LB: loop body
LE: loop exit
PB: predicated region body
PF: predicated region fallthrough
CT: control target
= control target key end

     0   :  { %7 = vsyncpa [#allocation5], 0  ;;  %s842_s0 = inlined_call_operand.hbm [shape: f32[2,3], index: 0, kind: input, shape index: {}]   ;;  %s843_s1 = inlined_call_operand.hbm [shape: f32[2,3,16,16], index: 1, kind: input, shape index: {}]   ;;  %s844_s2 = inlined_call_operand.hbm [shape: f32[2,1,8,16], index: 2, kind: output, shape index: {}]  }
   0x1   :  { %8 = vsyncpa [#allocation3], 0 }
   0x2   :  { %10 = vsyncpa [#allocation3 + $0x1], 0 }
   0x3   :  { %11 = vsyncpa [#allocation4], 0 }
   0x4   :  { %13 = vsyncpa [#allocation4 + $0x1], 0  ;;  %s628_s9 = smov 0   ;;  %s630_s10 = smov 0  }
   0x5   :  { %s632_s11 = smov 0   ;;  %s634_s12 = smov 0  }
   0x6   :  { %s636_s13 = smov 0   ;;  %s638_s14 = smov 0  }
   0x7 LB: > { %s375_s15 = sadd.s32 4294967295, %s605_s14   ;;  %s376_s16 = sadd.s32 4294967294, %s605_s14   ;;  %s605_s14 = sphi %s638_s14, %s19_s14   ;;  %s601_s13 = sphi %s636_s13, %s864_s13   ;;  %s597_s12 = sphi %s634_s12, %s863_s12   ;;  %s593_s11 = sphi %s632_s11, %s862_s11   ;;  %s589_s10 = sphi %s630_s10, %s861_s10   ;;  %s585_s9 = sphi %s628_s9, %s860_s9  }
   0x8   : > { %s70_s17 = sadd.s32 1, %s593_s11  ;;  %p77_p0 = scmp.ne.s32.totalorder %s593_s11, %s589_s10 }
   0x9   : > { %p78_p1 = scmp.eq.s32.totalorder %s605_s14, 0  ;;  %p83_p2 = scmp.ne.s32.totalorder %s589_s10, %s585_s9 }
   0xa   : > { %p666_p3 = scmp.eq.s32.totalorder %s375_s15, 0  ;;  %p109_p4 = scmp.eq.s32.totalorder %s375_s15, 1 }
   0xb   : > { %p79_p5 = por %p78_p1, %p77_p0  ;;  %p115_p6 = scmp.eq.s32.totalorder %s376_s16, 1 }
   0xc   : > { %s849_s18 = scalar_select %p666_p3, 1, 0 }
   0xd   : > { %p672_p7 = por %p666_p3, %p83_p2  ;;  %p676_p8 = por %p109_p4, %p77_p0 }
   0xe   : > { %p680_p9 = por %p115_p6, %p83_p2  ;;  %p377_p10 = scmp.ge.s32.totalorder %s605_s14, 1 }
   0xf   : > { %s850_s19 = scalar_select %p672_p7, 1, 0 }
  0x10   : > { %s851_s20 = scalar_select %p676_p8, 1, 0 }
  0x11   : > { %s852_s21 = scalar_select %p680_p9, 1, 0 }
  0x12   : > { %p122_p11 = scmp.lt.s32.totalorder %s605_s14, 3  ;;  %p417_p1 = scmp.lt.s32.totalorder %s605_s14, 2 }
  0x13   : > { %s144_s23 = sand.u32 1, %s593_s11   ;;  %s38_s25 = sadd.s32 1, %s601_s13 }
  0x14   : > { %p687_p13 = pnand %p377_p10, %p122_p11  ;;  %p695_p0 = pnand %p417_p1, %p79_p5 }
  0x15   : > { %s393_s26 = smul.u32 48, %s144_s23  ;;  %p40_p4 = scmp.ge.s32.totalorder %s38_s25, 2 }
  0x16   : > { %p404_p7 = pneg %p687_p13  ;;  %s476_s29 = scalar_lea.hbm %s842_s0, 32 }
  0x17   : > { %p477_p6 = scmp.ne.s32.totalorder %s842_s0, %s476_s29  ;;  %p483_p5 = scmp.lt.u32.totalorder %s476_s29, %s842_s0 }
  0x18   : > { %p405_p2 = pnand %p404_p7, %p666_p3 }
  0x1a   : > { %p478_p10 = pneg %p405_p2 }
  0x1c   : > { %p479_p11 = pnand %p478_p10, %p477_p6 }
  0x1e   : > { %p480_p12 = pneg %p479_p11 }
  0x20   : > { %p485_p1 = pnand %p483_p5, %p480_p12 }
  0x22   : > { %488 = shalt.err (!%p485_p1)
}
  0x23   : > { %s607_s6 = smov [#allocation2]   ;;  %s866_s25 = smov (%p40_p4, %s38_s25), 0 }
  0x24   : > { %407 = dma.hbm_to_smem (!%p405_p2), %s842_s0, 32, %s607_s6, [#allocation5]  }
  0x25   : > { %s394_s15 = smul.u32 768, %s601_s13  ;;  %s65_s16 = ssub.s32 %s601_s13, %s866_s25 }
  0x26   : > { %s148_s27 = scalar_lea.vmem [#allocation6], %s393_s26  ;;  %p68_p7 = scmp.eq.s32.totalorder %s65_s16, 0 }
  0x27   : > { %s158_s28 = sshll.u32 %s148_s27, 4  ;;  %s722_s3 = scalar_lea.hbm %s843_s1, %s394_s15  ;;  %s724_s28 = int_to_ptr.vmem [resolvable:$true] %s158_s28 }
  0x28   : > { %s729_s4 = scalar_select %p68_p7, %s593_s11, %s70_s17  }
  0x29   : > { %s731_s5 = scalar_lea.sflag [#allocation3], %s144_s23  ;;  %s489_s6 = scalar_lea.hbm %s722_s3, 768 }
  0x2a   : > { %p490_p12 = scmp.ne.s32.totalorder %s722_s3, %s489_s6  ;;  %p491_p2 = pneg %p695_p0 }
  0x2b   : > { %s494_s8 = scalar_lea.hbm %s843_s1, 1536  ;;  %p495_p10 = scmp.lt.u32.totalorder %s722_s3, %s843_s1 }
  0x2c   : > { %p492_p4 = pnand %p491_p2, %p490_p12  ;;  %p496_p11 = scmp.lt.u32.totalorder %s494_s8, %s489_s6 }
  0x2d   : > { %p498_p1 = scmp.lt.u32.totalorder %s489_s6, %s722_s3 }
  0x2e   : > { %p493_p6 = pneg %p492_p4  ;;  %p497_p5 = por %p496_p11, %p495_p10 }
  0x30   : > { %p499_p7 = por %p498_p1, %p497_p5 }
  0x32   : > { %p500_p9 = pnand %p499_p7, %p493_p6 }
  0x34   : > { %503 = shalt.err (!%p500_p9)
}
  0x35   : > { %s504_s17 = scalar_lea.vmem %s724_s28, 768  ;;  %s608_s23 = smov [#allocation6]  }
  0x36   : > { %p505_p12 = scmp.ne.s32.totalorder %s724_s28, %s504_s17  ;;  %s509_s27 = sshll.u32 %s608_s23, 4  ;;  %s510_s27 = int_to_ptr.vmem [resolvable:$false] %s509_s27 }
  0x37   : > { %s511_s29 = scalar_lea.vmem %s510_s27, 1536  ;;  %p512_p3 = scmp.lt.s32.totalorder %s724_s28, %s510_s27 }
  0x38   : > { %p507_p4 = pnand %p505_p12, %p491_p2  ;;  %p513_p10 = scmp.lt.s32.totalorder %s511_s29, %s504_s17 }
  0x3a   : > { %p508_p8 = pneg %p507_p4  ;;  %p514_p11 = por %p513_p10, %p512_p3 }
  0x3c   : > { %p515_p5 = pnand %p514_p11, %p508_p8 }
  0x3e   : > { %518 = shalt.err (!%p515_p5)
}
  0x3f   : > { %s609_s30 = smov 128   ;;  %s610_s6 = smov 8  }
  0x40   : > { %411 = dma.hbm_to_vmem [thread:$0]  (!%p695_p0), %s722_s3, 768, %s724_s28, %s731_s5, %s609_s30, %s609_s30, %s610_s6  }
  0x41   : > { %170 = sbr.rel (%p687_p13) target bundleno = 132 (0x84), region = 28  ;;  %p855_p9 = scmp.ne.s32.totalorder (!%p687_p13), %s849_s18, 0 }
  0x48   : > { %572 = dma.done.wait (%p855_p9), [#allocation5], 32  }
  0x49   : > { %574 = vsyncadd (%p855_p9), [#allocation5], 4294967264  ;;  %s766_s26 = sand.u32 1, %s589_s10   ;;  %p856_p3 = scmp.ne.s32.totalorder %s850_s19, 0 }
  0x4a   : > { %s395_s7 = smul.u32 48, %s766_s26  ;;  %s177_s8 = scalar_lea.sflag [#allocation3], %s766_s26 }
  0x4c   : > { %s180_s15 = scalar_lea.vmem [#allocation6], %s395_s7 }
  0x4d   : > { %576 = dma.done.wait (%p856_p3), %s177_s8, 768  }
  0x4e   : > { %578 = vsyncadd (%p856_p3), %s177_s8, 4294966528 }
  0x4f   : > { %185 = sfence }
  0x50   : > { %s383_s22 = sshll.u32 %s766_s26, 3  ;;  %vm208_vm0 = vcmask 130048   ;;  %s776_s18 = sshll.u32 %s597_s12, 7  ;;  %v611_v0 = vmov 0.0   ;;  %v210_v1 = vld [vmem:[%s180_s15] sm:$0xff]  ;;  %v211_v2 = vld [vmem:[%s180_s15 + $0x8] sm:$0xff] }
  0x51   : > { %s778_s24 = scalar_lea.vmem [#allocation7], %s383_s22  ;;  %s219_s28 = sld [smem:[#allocation2 + %s776_s18]]  ;;  %v384_v3 = vld [vmem:[%s180_s15 + $0x10] sm:$0xff]  ;;  %v385_v4 = vld [vmem:[%s180_s15 + $0x18] sm:$0xff]  ;;  %v386_v5 = vld [vmem:[%s180_s15 + $0x20] sm:$0xff] }
  0x52   : > { %209 = vst.msk [vmem:[%s778_s24] sm:$0xff] %vm208_vm0, %v611_v0  ;;  %s223_s3 = sadd.s32 1, %s776_s18  ;;  %s228_s5 = sadd.s32 2, %s776_s18  ;;  %v387_v6 = vld [vmem:[%s180_s15 + $0x28] sm:$0xff] }
  0x53   : > { %s224_s19 = sld [smem:[#allocation2 + %s223_s3]]  ;;  %s277_s12 = sshll.u32 %s778_s24, 4  ;;  %s793_s12 = int_to_ptr.vmem [resolvable:$true] %s277_s12 }
  0x54   : > { %s229_s16 = sld [smem:[#allocation2 + %s228_s5]]  ;;  %s791_s27 = scalar_lea.hbm %s844_s2, %s776_s18 }
  0x55   : > { %s263_s29 = scalar_lea.sflag [#allocation4], %s766_s26  ;;  %s519_s30 = scalar_lea.vmem %s793_s12, 128 }
  0x56   : > { %p520_p8 = scmp.ne.s32.totalorder %s793_s12, %s519_s30  ;;  %p857_p13 = scmp.ne.s32.totalorder %s851_s20, 0 }
  0x57   : > { %v220_v7 = vstv %s219_s28  ;;  %s612_s6 = smov [#allocation7]  }
  0x58   : > { %v221_v8 = vsub.f32 %v210_v1, %v220_v7  ;;  %v222_v9 = vsub.f32 %v211_v2, %v220_v7  ;;  %p521_p0 = pnand %p520_p8, %p857_p13  ;;  %s523_s7 = sshll.u32 %s612_s6, 4  ;;  %s524_s7 = int_to_ptr.vmem [resolvable:$false] %s523_s7 }
  0x59   : > { %v225_v10 = vstv %s224_s19  ;;  %v258_v36 = vld [vmem:[%s778_s24] sm:$0xff]  ;;  %s525_s8 = scalar_lea.vmem %s524_s7, 256  ;;  %p526_p6 = scmp.lt.s32.totalorder %s793_s12, %s524_s7 }
  0x5a   : > { %v226_v11 = vsub.f32 %v384_v3, %v225_v10  ;;  %v227_v12 = vsub.f32 %v385_v4, %v225_v10  ;;  %v230_v13 = vstv %s229_s16  ;;  %v233_v16 = vmul.f32 %v221_v8, %v221_v8  ;;  %p522_p2 = pneg %p521_p0  ;;  %p527_p1 = scmp.lt.s32.totalorder %s525_s8, %s519_s30 }
  0x5b   : > { %v231_v14 = vsub.f32 %v386_v5, %v230_v13  ;;  %v232_v15 = vsub.f32 %v387_v6, %v230_v13  ;;  %v234_v17 = vmul.f32 %v222_v9, %v222_v9 }
  0x5c   : > { %v235_v18 = vmul.f32 %v226_v11, %v226_v11  ;;  %v236_v19 = vmul.f32 %v227_v12, %v227_v12  ;;  %p528_p7 = por %p527_p1, %p526_p6 }
  0x5d   : > { %v239_v20 = vmul.f32 %v231_v14, %v231_v14  ;;  %v240_v21 = vmul.f32 %v232_v15, %v232_v15 }
  0x5e   : > { %v237_v22 = vadd.f32 %v235_v18, %v233_v16  ;;  %v238_v23 = vadd.f32 %v236_v19, %v234_v17  ;;  %p529_p12 = pnand %p528_p7, %p522_p2 }
  0x60   : > { %v241_v24 = vadd.f32 %v239_v20, %v237_v22  ;;  %v242_v25 = vadd.f32 %v240_v21, %v238_v23 }
  0x62   : > { %472 = vrsqrt.f32 %v241_v24  ;;  %vm245_vm1 = vcmp.eq.f32.partialorder %v241_v24, inf  ;;  %v248_v27 = vand.u32 2147483648, %v241_v24  ;;  %vm247_vm2 = vcmp.eq.f32.partialorder %v241_v24, 0.0 }
  0x63   : > { %474 = vrsqrt.f32 %v242_v25  ;;  %vm252_vm3 = vcmp.eq.f32.partialorder %v242_v25, inf  ;;  %v255_v30 = vand.u32 2147483648, %v242_v25  ;;  %vm254_vm4 = vcmp.eq.f32.partialorder %v242_v25, 0.0 }
  0x6c   : > { %v473_v26 = vpop.eup %472 }
  0x6d   : > { %v475_v28 = vpop.eup %474  ;;  %v244_v29 = vmul.f32 %v473_v26, %v241_v24 }
  0x6e   : > { %v251_v31 = vmul.f32 %v475_v28, %v242_v25 }
  0x6f   : > { %v246_v32 = vsel %vm245_vm1, %v241_v24, %v244_v29 }
  0x70   : > { %v249_v33 = vsel %vm247_vm2, %v248_v27, %v246_v32  ;;  %v253_v34 = vsel %vm252_vm3, %v242_v25, %v251_v31 }
  0x71   : > { %v256_v35 = vsel %vm254_vm4, %v255_v30, %v253_v34 }
  0x72   : > { %v257_v37 = vadd.f32 %v256_v35, %v249_v33 }
  0x74   : > { %v259_v38 = vadd.f32 %v258_v36, %v257_v37 }
  0x76   : > { %261 = vst.msk [vmem:[%s778_s24] sm:$0xff] %vm208_vm0, %v259_v38 }
  0x77   : > { %532 = shalt.err (!%p529_p12)
}
  0x78   : > { %s533_s26 = scalar_lea.hbm %s791_s27, 128  ;;  %s537_s18 = scalar_lea.hbm %s844_s2, 256 }
  0x79   : > { %p534_p4 = scmp.ne.s32.totalorder %s791_s27, %s533_s26  ;;  %p538_p5 = scmp.lt.u32.totalorder %s791_s27, %s844_s2 }
  0x7a   : > { %p539_p9 = scmp.lt.u32.totalorder %s537_s18, %s533_s26  ;;  %p541_p8 = scmp.lt.u32.totalorder %s533_s26, %s791_s27 }
  0x7b   : > { %p535_p10 = pnand %p534_p4, %p857_p13 }
  0x7c   : > { %p540_p3 = por %p539_p9, %p538_p5 }
  0x7d   : > { %p536_p11 = pneg %p535_p10 }
  0x7e   : > { %p542_p0 = por %p541_p8, %p540_p3 }
  0x80   : > { %p543_p2 = pnand %p542_p0, %p536_p11 }
  0x82   : > { %546 = shalt.err (!%p543_p2)
}
  0x83   : > { %402 = dma.vmem_to_hbm [thread:$0]  (%p857_p13), %s793_s12, 128, %s791_s27, %s263_s29  }
  0x84 PF: > { %s289_s3 = sand.u32 1, %s585_s9   ;;  %p858_p6 = scmp.ne.s32.totalorder %s852_s21, 0 }
  0x85   : > { %p859_p1 = scmp.ge.s32.totalorder %s605_s14, 2  ;;  %s290_s19 = scalar_lea.sflag [#allocation4], %s289_s3 }
  0x87   : > { %p413_p7 = pnand %p859_p1, %p858_p6 }
  0x89   : > { %580 = dma.done.wait (!%p413_p7), %s290_s19, 128  }
  0x8a   : > { %582 = vsyncadd (!%p413_p7), %s290_s19, 4294967168  ;;  %s19_s14 = sadd.s32 1, %s605_s14   ;;  %s860_s9 = smov %s589_s10 }
  0x8b   : > { %p16_p12 = scmp.ge.s32.totalorder %s19_s14, 4   ;;  %s861_s10 = smov %s593_s11 }
  0x8c   : > { %s862_s11 = smov %s729_s4  ;;  %s863_s12 = smov %s601_s13 }
  0x8d   : > { %s864_s13 = smov %s866_s25  ;;  %18 = sbr.rel (!%p16_p12) target bundleno = 7 (0x7), region = 84 }
  0x94   :  { %295 = vsyncpa [#allocation3], 1 }
  0x95   :  { %297 = vsyncpa [#allocation3 + $0x1], 1 }
  0x96   :  { %298 = vsyncpa [#allocation4], 1 }
  0x97   :  { %300 = vsyncpa [#allocation4 + $0x1], 1 }
  0x98   :  { %301 = vsyncpa [#allocation5], 1 }
  0x99   :  { %303 = vsyncpa [#allocation5 + $0x1], 1 }

</bundles_post_ra>
